<compile_context>
chip_gen: v5e
topology: v5e:2x2
jax: 0.10.0
libtpu: 0.0.40
codegen_flags: <defaults>
</compile_context>

<pallas_src>
import jax
import jax.numpy as jnp
from jax.experimental import pallas as pl
from jax.experimental.pallas import tpu as pltpu


def _make_copy_kernel(bounds):
    """Build a kernel that issues one HBM->HBM DMA per static (start, size) slice."""
    if bounds is None:
        # Whole-array single DMA (small tensors, 0-d tensors, dim0 < 2).
        def kernel(x_hbm, o_hbm, sem):
            cp = pltpu.make_async_copy(x_hbm, o_hbm, sem.at[0])
            cp.start()
            cp.wait()
        return kernel

    def kernel(x_hbm, o_hbm, sem):
        # Issue all DMAs back-to-back (concurrent, one engine stream each),
        # then wait on all of them.
        copies = []
        for i, (start, size) in enumerate(bounds):
            cp = pltpu.make_async_copy(
                x_hbm.at[pl.ds(start, size)],
                o_hbm.at[pl.ds(start, size)],
                sem.at[i],
            )
            cp.start()
            copies.append(cp)
        for cp in copies:
            cp.wait()

    return kernel


def identity(x: jax.Array) -> jax.Array:
    """nn.Identity forward: a true no-op (zero HBM traffic)."""
    return x


def identity_copy(
    x: jax.Array,
    *,
    num_chunks: int = 8,
    min_pallas_bytes: int = 1 << 20,   # below this, skip the custom call entirely
    chunk_threshold_bytes: int = 8 << 20,  # only multi-DMA for >= ~8 MiB tensors
) -> jax.Array:
    """Identity that materializes a fresh output buffer.

    Small tensors bypass Pallas (launch overhead dominates a sub-µs copy);
    large tensors use one pallas_call with multiple concurrent HBM->HBM DMAs.
    """
    nbytes = x.size * x.dtype.itemsize

    if nbytes < min_pallas_bytes:
        # Plain XLA copy: fusible / elidable, no opaque custom call.
        return jnp.copy(x)

    # Decide chunking (all static at trace time).
    if x.ndim >= 1 and x.shape[0] >= 2 and nbytes >= chunk_threshold_bytes:
        n = min(num_chunks, x.shape[0])
        dim0 = x.shape[0]
        base, rem = divmod(dim0, n)
        bounds = []
        start = 0
        for i in range(n):
            size = base + (1 if i < rem else 0)
            bounds.append((start, size))
            start += size
    else:
        n = 1
        bounds = None

    kernel = _make_copy_kernel(bounds)

    return pl.pallas_call(
        kernel,
        out_shape=jax.ShapeDtypeStruct(x.shape, x.dtype),
        in_specs=[pl.BlockSpec(memory_space=pl.ANY)],   # raw HBM ref, no auto-DMA
        out_specs=pl.BlockSpec(memory_space=pl.ANY),    # raw HBM ref, no auto-DMA
        scratch_shapes=[pltpu.SemaphoreType.DMA((n,))],
        cost_estimate=pl.CostEstimate(
            flops=0, transcendentals=0, bytes_accessed=2 * nbytes
        ),
    )(x)


if __name__ == "__main__":
    key = jax.random.PRNGKey(0)
    # Shape consistent with a UNet block input: NCHW.
    x = jax.random.normal(key, (2, 4, 16, 16), dtype=jnp.float32)

    # Real module semantics: a no-op.
    y_noop = identity(x)
    assert y_noop is x

    # Exercise the Pallas DMA-copy path once (force it despite the small size).
    y = identity_copy(x, min_pallas_bytes=0)
    jax.block_until_ready(y)

    assert y.shape == x.shape, (y.shape, x.shape)
    assert y.dtype == x.dtype, (y.dtype, x.dtype)
    assert bool(jnp.all(y == x)), "Identity kernel output mismatch"

    print("KERNEL_OK")
</pallas_src>

<mosaic_0001>
module attributes {stable_mosaic.version = 11 : i64} {
  func.func @kernel(%arg0: memref<2x4x16x16xf32, #tpu.memory_space<any>>, %arg1: memref<2x4x16x16xf32, #tpu.memory_space<any>>, %arg2: memref<1x!tpu.dma_semaphore, #tpu.memory_space<semaphore_mem>>) attributes {dimension_semantics = [], scalar_prefetch = 0 : i64, scratch_operands = 1 : i64, tpu.core_type = #tpu.core_type<tc>} {
    %c0_i32 = arith.constant 0 : i32
    %0 = tpu.memref_slice %arg2[%c0_i32] : memref<1x!tpu.dma_semaphore, #tpu.memory_space<semaphore_mem>> -> memref<1x!tpu.dma_semaphore, #tpu.memory_space<semaphore_mem>>
    %1 = tpu.memref_squeeze %0 : memref<1x!tpu.dma_semaphore, #tpu.memory_space<semaphore_mem>> -> memref<!tpu.dma_semaphore, #tpu.memory_space<semaphore_mem>>
    tpu.enqueue_dma source(%arg0 : memref<2x4x16x16xf32, #tpu.memory_space<any>>) target(%arg1 : memref<2x4x16x16xf32, #tpu.memory_space<any>>) target_semaphore(%1 : memref<!tpu.dma_semaphore, #tpu.memory_space<semaphore_mem>>)
    %c0_i32_0 = arith.constant 0 : i32
    %2 = tpu.memref_slice %arg2[%c0_i32_0] : memref<1x!tpu.dma_semaphore, #tpu.memory_space<semaphore_mem>> -> memref<1x!tpu.dma_semaphore, #tpu.memory_space<semaphore_mem>>
    %3 = tpu.memref_squeeze %2 : memref<1x!tpu.dma_semaphore, #tpu.memory_space<semaphore_mem>> -> memref<!tpu.dma_semaphore, #tpu.memory_space<semaphore_mem>>
    tpu.wait_dma2 semaphore(%3 : memref<!tpu.dma_semaphore, #tpu.memory_space<semaphore_mem>>) src(%arg0 : memref<2x4x16x16xf32, #tpu.memory_space<any>>) dst(%arg1 : memref<2x4x16x16xf32, #tpu.memory_space<any>>)
    return
  }
}

</mosaic_0001>

<bundles_post_ra>
// kernel: tpu_custom_call.1
= control target key start
LH: loop header
LB: loop body
LE: loop exit
PB: predicated region body
PF: predicated region fallthrough
CT: control target
= control target key end

     0   :  { %s34_s12 = smov [#allocation2]   ;;  %s35_s13 = smov [#allocation3]   ;;  %s53_s0 = inlined_call_operand.hbm [shape: f32[2,4,16,16], index: 0, kind: input, shape index: {}]   ;;  %s54_s1 = inlined_call_operand.hbm [shape: f32[2,4,16,16], index: 1, kind: output, shape index: {}]  }
   0x1   :  { %s10_s8 = sshll.u32 %s53_s0, 4  ;;  %s12_s11 = sshll.u32 %s54_s1, 4  ;;  %s11_s8 = int_to_ptr.hbm [resolvable:$true] %s10_s8  ;;  %s13_s11 = int_to_ptr.hbm [resolvable:$true] %s12_s11 }
   0x2   :  { %s36_s14 = smov 0  }
   0x3   :  { %16 = dma.general %s11_s8, 2048, %s13_s11, %s34_s12, %s35_s13, [#allocation4], %s36_s14, 0  }
   0x4   :  { %32 = dma.done.wait [#allocation2], 2048 }
   0x5   :  { %33 = vsyncadd [#allocation2], 4294965248 }
   0x6   :  { %22 = vsyncmov [#allocation2] }
   0x9   :  { %s23_s15 = vpop.sfrf %22 }
   0xa   :  { %p28_p0 = scmp.ne.s32.totalorder %s23_s15, 0 }
   0xc   :  { %27 = shalt.err (%p28_p0)  }

</bundles_post_ra>
